<compile_context>
chip_gen: v5e
topology: v5e:2x2
jax: 0.10.0
libtpu: 0.0.40
codegen_flags: <defaults>
</compile_context>

<pallas_src>
import jax
import jax.numpy as jnp
from jax.experimental import pallas as pl
from jax.experimental.pallas import tpu as pltpu

_TK_MAX = 1024          # max K tile (single-block K path when F <= this)
_TN_FULL = 512          # out_features <= this -> full-extent N block
_TM_CANDS = (1024, 512, 256)
_TN_CANDS = (512, 256)


# ---------------------------------------------------------------------------
# Kernels
# ---------------------------------------------------------------------------

def _proj_kernel_single(x_ref, w_ref, b_ref, o_ref):
    """K fits in one block: one matmul per output tile, no reduction axis,
    no init/epilogue, no per-step read-modify-write of the output."""
    acc = jnp.dot(x_ref[...], w_ref[...], preferred_element_type=jnp.float32)
    o_ref[...] = (acc + b_ref[...]).astype(o_ref.dtype)


def _proj_kernel_kloop(x_ref, w_ref, b_ref, o_ref, acc_ref):
    """F > _TK_MAX: classic K-resident f32 accumulator, bias in the epilogue.
    Correctness relies on the output index_map being k-invariant and the K
    axis being marked 'arbitrary' (K innermost in the grid)."""
    k = pl.program_id(2)

    @pl.when(k == 0)
    def _():
        acc_ref[...] = jnp.zeros_like(acc_ref)

    acc_ref[...] += jnp.dot(
        x_ref[...], w_ref[...], preferred_element_type=jnp.float32
    )

    @pl.when(k == pl.num_programs(2) - 1)
    def _():
        o_ref[...] = (acc_ref[...] + b_ref[...]).astype(o_ref.dtype)


# ---------------------------------------------------------------------------
# Tile planning
# ---------------------------------------------------------------------------

def _pick_tile(dim, cands, full_if_leq):
    """Full extent when small; otherwise the candidate (<= dim) minimizing
    last-block round-up waste, preferring the larger tile on ties."""
    if dim <= full_if_leq:
        return dim
    best_key, best_c = None, None
    for c in cands:
        if c > dim:
            continue
        waste = (-(-dim // c)) * c - dim
        key = (waste, -c)
        if best_key is None or key < best_key:
            best_key, best_c = key, c
    return best_c if best_c is not None else dim


def _pick_tk(F):
    """K tile must divide F exactly (no K padding) unless we pad explicitly.
    Returns (tk, need_explicit_k_pad)."""
    if F <= _TK_MAX:
        return F, False
    # Largest multiple-of-128 divisor of F that fits in one block.
    for d in range(_TK_MAX, 127, -128):
        if F % d == 0:
            return d, False
    return 512, True  # fall back to zero-padding K on BOTH operands


# ---------------------------------------------------------------------------
# Wrapper
# ---------------------------------------------------------------------------

def fuse_head_weights(head_weights, compute_dtype=None):
    """Fuse per-head PyTorch-layout weights (out_features, head_dim) into a
    single (F = heads*head_dim, out_features) matrix.  Weights are static
    between steps, so callers should fuse (and optionally pre-cast) once."""
    w = jnp.concatenate([jnp.asarray(w).T for w in head_weights], axis=0)
    if compute_dtype is not None:
        w = w.astype(compute_dtype)
    return w


def output_projection_ita(x, head_weights, bias, heads, *, compute_dtype=None):
    """x: (B, S, in_features).
    head_weights: either a list of `heads` arrays of shape (out_features,
                  head_dim) (PyTorch Linear layout) or a pre-fused
                  (in_features, out_features) array from fuse_head_weights.
    bias: (out_features,).
    compute_dtype: dtype fed to the MXU (e.g. jnp.bfloat16); accumulation is
                   always f32.  Defaults to x.dtype.
    Returns (B, S, out_features) in x.dtype."""
    B, S, F = x.shape
    M = B * S

    if isinstance(head_weights, (list, tuple)):
        w_full = fuse_head_weights(head_weights)          # (F, out)
    else:
        w_full = head_weights                             # pre-fused (F, out)
    assert w_full.shape[0] == F, "fused weight must be (in_features, out)"
    out_features = w_full.shape[1]

    out_dtype = x.dtype
    compute_dtype = compute_dtype or x.dtype

    x2d = x.reshape(M, F).astype(compute_dtype)           # free reshape
    w_full = w_full.astype(compute_dtype)
    b2d = bias.reshape(1, out_features).astype(jnp.float32)

    # --- tile plan ---------------------------------------------------------
    tm = _pick_tile(M, _TM_CANDS, full_if_leq=256)
    tn = _pick_tile(out_features, _TN_CANDS, full_if_leq=_TN_FULL)
    tk, need_kpad = _pick_tk(F)

    Kp = F
    if need_kpad:
        # Zero-pad K on BOTH operands: padded products are exactly zero, so
        # nothing spurious accumulates into real outputs.
        Kp = (-(-F // tk)) * tk
        x2d = jnp.pad(x2d, ((0, 0), (0, Kp - F)))
        w_full = jnp.pad(w_full, ((0, Kp - F), (0, 0)))

    mb = -(-M // tm)
    nb = -(-out_features // tn)
    kb = Kp // tk

    # VMEM budget: double-buffered inputs/output (+ acc scratch on the K-loop
    # path).  Floor 32 MiB (v5e's default scoped limit is only 16 MiB), cap
    # 48 MiB (v7x has 64 MiB per TensorCore).
    cbytes = jnp.dtype(compute_dtype).itemsize
    obytes = jnp.dtype(out_dtype).itemsize
    footprint = (2 * (tm * tk + tk * tn) * cbytes
                 + 2 * tm * tn * obytes
                 + (tm * tn * 4 if kb > 1 else 0)
                 + 2 * 8 * max(tn, 128) * 4)
    vmem_limit = min(48 << 20, max(32 << 20, (footprint * 3) // 2))

    if kb == 1:
        # Single-block K: no reduction axis at all.  When nb == 1 (typical
        # ITA sizes) the weight and bias index_maps are constant, so they are
        # DMA'd once and stay VMEM-resident across all M steps.
        grid = (mb, nb)
        in_specs = [
            pl.BlockSpec((tm, tk), lambda i, j: (i, 0)),   # x tile
            pl.BlockSpec((tk, tn), lambda i, j: (0, j)),   # fused weight
            pl.BlockSpec((1, tn), lambda i, j: (0, j)),    # bias
        ]
        out_specs = pl.BlockSpec((tm, tn), lambda i, j: (i, j))
        kernel = _proj_kernel_single
        scratch = []
        dims = ("parallel", "parallel")                    # megacore-shardable
    else:
        grid = (mb, nb, kb)
        in_specs = [
            pl.BlockSpec((tm, tk), lambda i, j, k: (i, k)),
            pl.BlockSpec((tk, tn), lambda i, j, k: (k, j)),
            pl.BlockSpec((1, tn), lambda i, j, k: (0, j)),
        ]
        out_specs = pl.BlockSpec((tm, tn), lambda i, j, k: (i, j))
        kernel = _proj_kernel_kloop
        scratch = [pltpu.VMEM((tm, tn), jnp.float32)]
        dims = ("parallel", "parallel", "arbitrary")

    out = pl.pallas_call(
        kernel,
        out_shape=jax.ShapeDtypeStruct((M, out_features), out_dtype),
        grid_spec=pltpu.PrefetchScalarGridSpec(
            num_scalar_prefetch=0,
            grid=grid,
            in_specs=in_specs,
            out_specs=out_specs,
            scratch_shapes=scratch,
        ),
        compiler_params=pltpu.CompilerParams(
            dimension_semantics=dims,
            vmem_limit_bytes=int(vmem_limit),
        ),
    )(x2d, w_full, b2d)

    return out.reshape(B, S, out_features)


# ---------------------------------------------------------------------------
# Reference + tests
# ---------------------------------------------------------------------------

def _reference(x, head_weights, bias, heads):
    """Pure-JAX mirror of the PyTorch forward."""
    B, S, F = x.shape
    hd = F // heads
    x_r = x.reshape(B, S, heads, hd).transpose(0, 2, 1, 3)   # (B, heads, S, hd)
    return bias + sum(
        jnp.einsum("bsd,od->bso", x_r[:, i], head_weights[i])
        for i in range(heads)
    )


def _make_case(key, B, S, in_features, out_features, heads):
    hd = in_features // heads
    kx, kb, *kw = jax.random.split(key, 2 + heads)
    x = jax.random.normal(kx, (B, S, in_features), dtype=jnp.float32)
    head_weights = [
        jax.random.normal(kw[i], (out_features, hd), dtype=jnp.float32) * 0.1
        for i in range(heads)
    ]
    bias = jax.random.normal(kb, (out_features,), dtype=jnp.float32) * 0.1
    return x, head_weights, bias


def _check(out, ref, shape, tol):
    assert out.shape == shape
    assert jnp.allclose(out, ref, atol=tol, rtol=tol), "mismatch vs reference"


if __name__ == "__main__":
    # 1) Small shapes consistent with the module (single-block fast path).
    B, S, Fin, Fout, H = 2, 8, 32, 32, 4
    x, hw, b = _make_case(jax.random.PRNGKey(0), B, S, Fin, Fout, H)
    out = jax.block_until_ready(output_projection_ita(x, hw, b, H))
    _check(out, _reference(x, hw, b, H), (B, S, Fout), 1e-4)

    # 2) Moderate shapes: ragged M / N blocks (no padding, no output slice),
    #    pre-fused weight passed in (cached between calls).
    B, S, Fin, Fout, H = 2, 520, 384, 300, 6
    x, hw, b = _make_case(jax.random.PRNGKey(0), B, S, Fin, Fout, H)
    w_fused = fuse_head_weights(hw)
    out = jax.block_until_ready(output_projection_ita(x, w_fused, b, H))
    _check(out, _reference(x, hw, b, H), (B, S, Fout), 1e-3)

    # 3) Same shapes on the bf16 MXU path (f32 accumulation), looser tolerance.
    out = jax.block_until_ready(
        output_projection_ita(x, w_fused, b, H, compute_dtype=jnp.bfloat16)
    )
    _check(out, _reference(x, hw, b, H), (B, S, Fout), 2e-2)

    # 4) Large F exercising the K-loop accumulator path (tk divides F exactly).
    B, S, Fin, Fout, H = 2, 64, 2560, 256, 8
    x, hw, b = _make_case(jax.random.PRNGKey(0), B, S, Fin, Fout, H)
    out = jax.block_until_ready(output_projection_ita(x, hw, b, H))
    _check(out, _reference(x, hw, b, H), (B, S, Fout), 2e-3)

    print("KERNEL_OK")
</pallas_src>

<mosaic_0001>
module attributes {stable_mosaic.version = 11 : i64} {
  func.func @_proj_kernel_single(%arg0: i32, %arg1: i32, %arg2: memref<16x32xf32, #tpu.memory_space<vmem>>, %arg3: memref<32x32xf32, #tpu.memory_space<vmem>>, %arg4: memref<1x32xf32, #tpu.memory_space<vmem>>, %arg5: memref<16x32xf32, #tpu.memory_space<vmem>>) attributes {dimension_semantics = [#tpu.dimension_semantics<parallel>, #tpu.dimension_semantics<parallel>], iteration_bounds = array<i64: 1, 1>, scalar_prefetch = 0 : i64, scratch_operands = 0 : i64, tpu.core_type = #tpu.core_type<tc>, window_params = [{transform_indices = @transform_0, window_bounds = array<i64: 16, 32>}, {transform_indices = @transform_1, window_bounds = array<i64: 32, 32>}, {transform_indices = @transform_2, window_bounds = array<i64: 1, 32>}, {transform_indices = @transform_3, window_bounds = array<i64: 16, 32>}]} {
    %c0 = arith.constant 0 : index
    %c0_0 = arith.constant 0 : index
    %0 = vector.load %arg2[%c0, %c0_0] : memref<16x32xf32, #tpu.memory_space<vmem>>, vector<16x32xf32>
    %c0_1 = arith.constant 0 : index
    %c0_2 = arith.constant 0 : index
    %1 = vector.load %arg3[%c0_1, %c0_2] : memref<32x32xf32, #tpu.memory_space<vmem>>, vector<32x32xf32>
    %cst = arith.constant dense<0.000000e+00> : vector<16x32xf32>
    %2 = tpu.matmul %0, %1, %cst {dimension_numbers = #tpu.dot_dimension_numbers<[1], [0], [0], [1], [0, 0, 1, 1], [], []>} : vector<16x32xf32>, vector<32x32xf32>, vector<16x32xf32> -> vector<16x32xf32>
    %c0_3 = arith.constant 0 : index
    %c0_4 = arith.constant 0 : index
    %3 = vector.load %arg4[%c0_3, %c0_4] : memref<1x32xf32, #tpu.memory_space<vmem>>, vector<1x32xf32>
    %4 = vector.broadcast %3 : vector<1x32xf32> to vector<16x32xf32>
    %5 = arith.addf %2, %4 : vector<16x32xf32>
    %c0_5 = arith.constant 0 : index
    %c0_6 = arith.constant 0 : index
    %6 = vector.load %arg5[%c0_5, %c0_6] : memref<16x32xf32, #tpu.memory_space<vmem>>, vector<16x32xf32>
    tpu.vector_store %arg5[%c0_5, %c0_6], %5 {strides = array<i32>} : memref<16x32xf32, #tpu.memory_space<vmem>>, vector<16x32xf32>,
    return
  }
  func.func @transform_0(%arg0: i32, %arg1: i32) -> (i32, i32) {
    %c0_i32 = arith.constant 0 : i32
    %c0_i32_0 = arith.constant 0 : i32
    return %arg0, %c0_i32 : i32, i32
  }
  func.func @transform_1(%arg0: i32, %arg1: i32) -> (i32, i32) {
    %c0_i32 = arith.constant 0 : i32
    %c0_i32_0 = arith.constant 0 : i32
    return %c0_i32, %arg1 : i32, i32
  }
  func.func @transform_2(%arg0: i32, %arg1: i32) -> (i32, i32) {
    %c0_i32 = arith.constant 0 : i32
    %c0_i32_0 = arith.constant 0 : i32
    return %c0_i32, %arg1 : i32, i32
  }
  func.func @transform_3(%arg0: i32, %arg1: i32) -> (i32, i32) {
    %c0_i32 = arith.constant 0 : i32
    return %arg0, %arg1 : i32, i32
  }
}

</mosaic_0001>

<bundles_post_ra>
// kernel: tpu_custom_call.1
= control target key start
LH: loop header
LB: loop body
LE: loop exit
PB: predicated region body
PF: predicated region fallthrough
CT: control target
= control target key end

     0   :  { %8 = vsyncpa [#allocation3], 0  ;;  %s249_s0 = inlined_call_operand.hbm [shape: f32[16,32], index: 0, kind: input, shape index: {}]   ;;  %s250_s1 = inlined_call_operand.hbm [shape: f32[32,32], index: 1, kind: input, shape index: {}]   ;;  %s251_s2 = inlined_call_operand.vmem [shape: f32[1,32], index: 2, kind: input, shape index: {}]   ;;  %s252_s3 = inlined_call_operand.hbm [shape: f32[16,32], index: 3, kind: output, shape index: {}]  }
   0x1   :  { %9 = vsyncpa [#allocation6], 0 }
   0x2   :  { %10 = vsyncpa [#allocation4], 0  ;;  %s15_s14 = sshll.u32 %s249_s0, 4  ;;  %s199_s15 = smov [#allocation2]   ;;  %s16_s14 = int_to_ptr.hbm [resolvable:$true] %s15_s14 }
   0x3   :  { %s17_s16 = sshll.u32 %s199_s15, 4  ;;  %s28_s19 = sshll.u32 %s250_s1, 4  ;;  %s18_s16 = int_to_ptr.vmem [resolvable:$true] %s17_s16  ;;  %s29_s19 = int_to_ptr.hbm [resolvable:$true] %s28_s19 }
   0x4   :  { %s200_s20 = smov 128   ;;  %s201_s21 = smov 8  }
   0x5   :  { %23 = dma.hbm_to_vmem [thread:$0]  %s16_s14, 256, %s18_s16, [#allocation3], %s200_s20, %s200_s20, %s201_s21  }
   0x6   :  { %s202_s22 = smov [#allocation5]  }
   0x7   :  { %s30_s23 = sshll.u32 %s202_s22, 4  ;;  %s31_s23 = int_to_ptr.vmem [resolvable:$true] %s30_s23 }
   0x8   :  { %36 = dma.hbm_to_vmem [thread:$0]  %s29_s19, 512, %s31_s23, [#allocation6], %s200_s20, %s200_s20, %s201_s21  }
   0x9   :  { %193 = dma.done.wait [#allocation3], 256  }
   0xa   :  { %194 = vsyncadd [#allocation3], 4294967040 }
   0xb   :  { %195 = dma.done.wait [#allocation6], 512  }
   0xc   :  { %196 = vsyncadd [#allocation6], 4294966784  ;;  %v52_v0 = vld [vmem:[#allocation5 + $0x18] sm:$0xff]  ;;  %v51_v1 = vld [vmem:[#allocation5 + $0x10] sm:$0xff]  ;;  %vm57_vm0 = vcmask 261120   ;;  %s203_s24 = smov [#allocation7]  }
   0xd   :  { %76 = vmatpush.msra.mxu0 %v52_v0  ;;  %111 = vmatpush.msra.mxu1 %v52_v0  ;;  %v50_v2 = vld [vmem:[#allocation5 + $0x8] sm:$0xff]  ;;  %v49_v3 = vld [vmem:[#allocation5] sm:$0xff]  ;;  %v47_v4 = vld [vmem:[#allocation2] sm:$0xff]  ;;  %s93_s25 = sshll.u32 %s203_s24, 4  ;;  %s95_s28 = sshll.u32 %s252_s3, 4  ;;  %s94_s25 = int_to_ptr.vmem [resolvable:$true] %s93_s25  ;;  %s96_s28 = int_to_ptr.hbm [resolvable:$true] %s95_s28 }
   0xe   :  { %v48_v5 = vld [vmem:[#allocation2 + $0x8] sm:$0xff]  ;;  %v120_v6 = vld [vmem:[%s251_s2] ss:$0 sm:$0xff] }
   0xf   :  { %77 = vmatpush.msra.mxu0 %v51_v1  ;;  %112 = vmatpush.msra.mxu1 %v51_v1 }
  0x11   :  { %78 = vmatpush.msra.mxu0 %v50_v2  ;;  %113 = vmatpush.msra.mxu1 %v50_v2 }
  0x13   :  { %79 = vmatpush.msra.mxu0 %v49_v3  ;;  %114 = vmatpush.msra.mxu1 %v49_v3 }
  0x14   :  { %109 = vmatmul.msk.f32.vlgmr.msra.gmra.mxu0 %vm57_vm0, %v47_v4  ;;  %110 = vmatmul.msk.f32.vlgmr.msra.gmra.mxu1 %vm57_vm0, %v48_v5 }
  0x91   :  { %v81_v7 = vpop.f32.mrf.mxu0  ;;  %v84_v8 = vpop.f32.mrf.mxu1 }
  0x92   :  { %v82_v9 = vadd.f32 %v120_v6, %v81_v7  ;;  %v85_v10 = vadd.f32 %v120_v6, %v84_v8 }
  0x94   :  { %87 = vst.msk [vmem:[#allocation7] sm:$0xff] %vm57_vm0, %v82_v9 }
  0x95   :  { %88 = vst.msk [vmem:[#allocation7 + $0x8] sm:$0xff] %vm57_vm0, %v85_v10 }
  0x96   :  { %101 = dma.vmem_to_hbm [thread:$0]  %s94_s25, 256, %s96_s28, [#allocation4], %s200_s20, %s200_s20, %s201_s21  }
  0x97   :  { %197 = dma.done.wait [#allocation4], 256  }
  0x98   :  { %198 = vsyncadd [#allocation4], 4294967040 }
  0x99   :  { %106 = vsyncpa [#allocation3], 1 }
  0x9a   :  { %107 = vsyncpa [#allocation6], 1 }
  0x9b   :  { %108 = vsyncpa [#allocation4], 1 }

</bundles_post_ra>
